<compile_context>
chip_gen: v5e
topology: v5e:2x2
jax: 0.10.0
libtpu: 0.0.40
codegen_flags: <defaults>
</compile_context>

<pallas_src>
import jax
import jax.numpy as jnp
import numpy as np
from jax.experimental import pallas as pl
from jax.experimental.pallas import tpu as pltpu


def _round_up(x, m):
    return ((x + m - 1) // m) * m


def _vmem_capacity_bytes():
    """Physical VMEM per TensorCore; fall back to the most restrictive (v7x)."""
    try:
        return int(pltpu.get_tpu_info().vmem_capacity_bytes)
    except Exception:
        return 64 * 1024 * 1024


def _vmem_bytes(tile_b, N, dims_pad, num_hidden):
    """Rough resident-VMEM estimate for one grid step (used to size the tile)."""
    r = tile_b * N
    f0, h, c = dims_pad[0], dims_pad[-2], dims_pad[-1]
    total = 2 * r * f0 * 2                      # x stream, double-buffered bf16
    total += 2 * tile_b * c * 4                 # output, double-buffered f32
    widest = max(dims_pad[: num_hidden + 1])    # live f32 acc + bf16 feed slabs
    total += r * widest * (4 + 2)
    for i in range(num_hidden):                 # single-buffered params
        total += dims_pad[i] * dims_pad[i + 1] * 2 + dims_pad[i + 1] * 4
    total += tile_b * r * 2                     # A_T selector (bf16)
    total += h * c * 2 + c * 4                  # final linear (bf16 W, f32 b)
    total += tile_b * h * 4                     # pred
    return total


def _choose_tile_b(B, N, fits, target_rows=1024, max_tile_b=256):
    """Batches per row tile.

    Honors:
      * row block (tb*N) sublane-aligned (multiple of 8); output block (tb)
        8-aligned whenever the grid has more than one step;
      * estimated resident VMEM (`fits`) stays inside the budget;
      * >= 2 grid steps when B is large enough (v7x has 2 TensorCores);
      * tb capped (max_tile_b) so A_T ([tb, tb*N]) doesn't grow quadratically.
    """
    unit = 8 // int(np.gcd(int(N), 8))          # tb % unit == 0  =>  (tb*N) % 8 == 0
    tb = min(max_tile_b, max(1, target_rows // max(int(N), 1)))

    if tb >= B:
        # One tile can cover every batch.  Prefer 2 grid steps for v7x when the
        # halves can stay 8-aligned on the output block.
        if B >= 16:
            half = _round_up((B + 1) // 2, 8)
            if half < B and fits(half):
                return half
        tb_full = _round_up(max(B, 1), unit)    # single step: block == full padded dim
        if fits(tb_full) or tb_full <= 8:
            return tb_full
        tb = min(tb, tb_full)                   # fall through to multi-step shrink

    # Multi-step grid: output block must be 8-aligned (implies tb*N % 8 == 0 too).
    tb = max(8, (tb // 8) * 8)
    while tb > 8 and not fits(tb):
        tb -= 8
    return tb


def _make_kernel(num_hidden, inv_n):
    """Fused hidden-MLP stack + atom-mean (bf16 MXU matmul) + final linear."""

    def kernel(x_ref, *refs):
        # refs = (w0,b0, ..., w_{H-1},b_{H-1}, A_T, W_last, b_last, out_ref)
        out_ref = refs[-1]
        params = refs[:-1]

        X = x_ref[...]                                   # bf16 [R_TILE, F0_pad]
        for i in range(num_hidden):
            W = params[2 * i][...]                       # bf16 [F_in_pad, F_out_pad]
            b = params[2 * i + 1][...]                   # f32  [1, F_out_pad]
            acc = jnp.dot(X, W, preferred_element_type=jnp.float32) + b
            X = jnp.maximum(acc, 0.0).astype(jnp.bfloat16)   # ReLU, bf16 feed onward
            # dropout: eval-mode identity

        A_T = params[2 * num_hidden][...]                # bf16 0/1 selector [TILE_B, R_TILE]
        Wl = params[2 * num_hidden + 1][...]             # bf16 [H_pad, C_pad]
        bl = params[2 * num_hidden + 2][...]             # f32  [1, C_pad]

        # Atom mean via MXU: bf16 selector x bf16 activations, f32 accumulate,
        # exact 1/N applied as an f32 scale.
        pred = jnp.dot(A_T, X, preferred_element_type=jnp.float32) * inv_n
        out_ref[...] = (jnp.dot(pred.astype(jnp.bfloat16), Wl,
                                preferred_element_type=jnp.float32) + bl)

    return kernel


def timeseries_classifier_forward(inputs, weights, biases, dropout_prob=0.0):
    """
    Args:
      inputs : [B, N, T, D]
      weights: list of [in_i, out_i] arrays (hidden layers, then final layer)
      biases : list of [out_i] arrays
    Returns:
      logits : [B, n_classes] float32
    """
    del dropout_prob  # eval-mode only (identity)
    B, N, T, D = inputs.shape
    num_layers = len(weights)
    num_hidden = num_layers - 1
    n_classes = weights[-1].shape[1]

    # ---- lane-padded feature sizes ----
    dims = [T * D] + [int(w.shape[1]) for w in weights]
    dims_pad = [_round_up(d, 128) for d in dims]
    F0_pad = dims_pad[0]
    H_pad = dims_pad[-2]
    C_pad = dims_pad[-1]

    # ---- VMEM budget & row tiling (whole batches per tile) ----
    vmem_cap = _vmem_capacity_bytes()
    vmem_budget = int(vmem_cap * 0.6)

    def fits(tb):
        return _vmem_bytes(tb, N, dims_pad, num_hidden) <= vmem_budget

    TILE_B = _choose_tile_b(B, N, fits)
    R_TILE = TILE_B * N
    B_pad = _round_up(B, TILE_B)
    R_pad = B_pad * N
    grid = (B_pad // TILE_B,)

    est = _vmem_bytes(TILE_B, N, dims_pad, num_hidden)
    vmem_limit = int(min(vmem_cap - (8 << 20), max(vmem_budget, est + (8 << 20))))
    vmem_limit = max(vmem_limit, 32 << 20)

    # ---- input: flatten rows, cast to bf16 FIRST, pad only if needed ----
    x = inputs.reshape(B * N, T * D)
    if x.dtype != jnp.bfloat16:
        x = x.astype(jnp.bfloat16)
    pad_r, pad_f = R_pad - B * N, F0_pad - T * D
    if pad_r or pad_f:
        x = jnp.pad(x, ((0, pad_r), (0, pad_f)))
    x_bf16 = x

    # ---- parameters: zero-pad to lane multiples; weights in bf16, biases f32 ----
    flat_params = []
    for i in range(num_hidden):
        W = jnp.asarray(weights[i], jnp.float32)
        b = jnp.asarray(biases[i], jnp.float32)
        Wp = jnp.pad(W, ((0, dims_pad[i] - W.shape[0]),
                         (0, dims_pad[i + 1] - W.shape[1])))
        bp = jnp.pad(b, (0, dims_pad[i + 1] - b.shape[0])).reshape(1, -1)
        flat_params += [Wp.astype(jnp.bfloat16), bp]

    # Atom-mean selector: A_T[b, r] = 1 iff row r belongs to tile-local batch b
    # (0/1 is exact in bf16); the 1/N scale is applied in f32 inside the kernel.
    row_batch = np.arange(R_TILE) // N
    A_T = (row_batch[None, :] == np.arange(TILE_B)[:, None]).astype(np.float32)
    flat_params.append(jnp.asarray(A_T, dtype=jnp.bfloat16))

    Wl = jnp.asarray(weights[-1], jnp.float32)
    bl = jnp.asarray(biases[-1], jnp.float32)
    Wlp = jnp.pad(Wl, ((0, H_pad - Wl.shape[0]), (0, C_pad - Wl.shape[1])))
    blp = jnp.pad(bl, (0, C_pad - bl.shape[0])).reshape(1, -1)
    flat_params += [Wlp.astype(jnp.bfloat16), blp]

    # ---- BlockSpecs (params: constant index map, single-buffered) ----
    x_spec = pl.BlockSpec((R_TILE, F0_pad), lambda r: (r, 0))
    param_specs = [
        pl.BlockSpec(p.shape, lambda r: (0, 0), pipeline_mode=pl.Buffered(1))
        for p in flat_params
    ]
    in_specs = [x_spec] + param_specs
    out_spec = pl.BlockSpec((TILE_B, C_pad), lambda r: (r, 0))

    # ---- advisory cost estimate ----
    flops = 0
    for i in range(num_hidden):
        flops += 2 * R_pad * dims_pad[i] * dims_pad[i + 1]
    flops += 2 * B_pad * R_TILE * H_pad          # atom-mean matmul
    flops += 2 * B_pad * H_pad * C_pad           # final linear
    bytes_accessed = (int(x_bf16.size) * int(x_bf16.dtype.itemsize)
                      + sum(int(np.prod(p.shape)) * int(p.dtype.itemsize)
                            for p in flat_params)
                      + B_pad * C_pad * 4)
    cost = pl.CostEstimate(flops=int(flops), transcendentals=0,
                           bytes_accessed=int(bytes_accessed))

    kernel = _make_kernel(num_hidden, float(1.0 / N))

    out = pl.pallas_call(
        kernel,
        out_shape=jax.ShapeDtypeStruct((B_pad, C_pad), jnp.float32),
        grid=grid,
        in_specs=in_specs,
        out_specs=out_spec,
        compiler_params=pltpu.CompilerParams(
            dimension_semantics=("parallel",),
            vmem_limit_bytes=int(vmem_limit),
        ),
        cost_estimate=cost,
    )(x_bf16, *flat_params)

    return out[:B, :n_classes]


def reference_forward(inputs, weights, biases):
    """Pure-JAX f32 reference matching the PyTorch forward (eval-mode dropout)."""
    B, N, T, D = inputs.shape
    X = inputs.reshape(B, N, T * D).astype(jnp.float32)
    for W, b in zip(weights[:-1], biases[:-1]):
        X = jnp.maximum(jnp.einsum("bnf,fo->bno", X, W) + b, 0.0)
    pred = jnp.mean(X, axis=1)
    return pred @ weights[-1] + biases[-1]


if __name__ == "__main__":
    # Small, module-consistent shapes.
    B, N, T, D = 2, 4, 8, 4            # batch, atoms, timesteps, dims
    n_in_node = T * D                  # 32
    mlp_hid_list = [32, 32]
    n_classes = 8
    dropout_prob = 0.0                 # eval-equivalent, deterministic

    all_dims = [n_in_node] + mlp_hid_list + [n_classes]

    key = jax.random.PRNGKey(0)
    keys = jax.random.split(key, 1 + 2 * (len(all_dims) - 1))

    inputs = jax.random.normal(keys[0], (B, N, T, D), dtype=jnp.float32)

    # Deterministic parameter init (PyTorch-Linear-like uniform), stored as [in, out].
    weights, biases = [], []
    for i in range(len(all_dims) - 1):
        fan_in, fan_out = all_dims[i], all_dims[i + 1]
        bound = 1.0 / np.sqrt(fan_in)
        W = jax.random.uniform(keys[1 + 2 * i], (fan_in, fan_out),
                               minval=-bound, maxval=bound, dtype=jnp.float32)
        b = jax.random.uniform(keys[2 + 2 * i], (fan_out,),
                               minval=-bound, maxval=bound, dtype=jnp.float32)
        weights.append(W)
        biases.append(b)

    logits = timeseries_classifier_forward(inputs, weights, biases, dropout_prob)
    logits = jax.block_until_ready(logits)

    ref = jax.block_until_ready(reference_forward(inputs, weights, biases))
    assert logits.shape == (B, n_classes)
    # bf16 operands everywhere (f32 accumulate) vs pure-f32 reference -> loose tolerance.
    assert np.allclose(np.asarray(logits), np.asarray(ref), atol=5e-2, rtol=5e-2), (
        np.max(np.abs(np.asarray(logits) - np.asarray(ref))))

    print("KERNEL_OK")
</pallas_src>

<mosaic_0001>
module attributes {stable_mosaic.version = 11 : i64} {
  func.func @kernel(%arg0: i32, %arg1: memref<8x128xbf16, #tpu.memory_space<vmem>>, %arg2: memref<128x128xbf16, #tpu.memory_space<vmem>>, %arg3: memref<1x128xf32, #tpu.memory_space<vmem>>, %arg4: memref<128x128xbf16, #tpu.memory_space<vmem>>, %arg5: memref<1x128xf32, #tpu.memory_space<vmem>>, %arg6: memref<2x8xbf16, #tpu.memory_space<vmem>>, %arg7: memref<128x128xbf16, #tpu.memory_space<vmem>>, %arg8: memref<1x128xf32, #tpu.memory_space<vmem>>, %arg9: memref<2x128xf32, #tpu.memory_space<vmem>>) attributes {dimension_semantics = [#tpu.dimension_semantics<parallel>], iteration_bounds = array<i64: 1>, scalar_prefetch = 0 : i64, scratch_operands = 0 : i64, tpu.core_type = #tpu.core_type<tc>, window_params = [{transform_indices = @transform_0, window_bounds = array<i64: 8, 128>}, {pipeline_mode = #tpu.pipeline_mode<synchronous>, transform_indices = @transform_1, window_bounds = array<i64: 128, 128>}, {pipeline_mode = #tpu.pipeline_mode<synchronous>, transform_indices = @transform_2, window_bounds = array<i64: 1, 128>}, {pipeline_mode = #tpu.pipeline_mode<synchronous>, transform_indices = @transform_3, window_bounds = array<i64: 128, 128>}, {pipeline_mode = #tpu.pipeline_mode<synchronous>, transform_indices = @transform_4, window_bounds = array<i64: 1, 128>}, {pipeline_mode = #tpu.pipeline_mode<synchronous>, transform_indices = @transform_5, window_bounds = array<i64: 2, 8>}, {pipeline_mode = #tpu.pipeline_mode<synchronous>, transform_indices = @transform_6, window_bounds = array<i64: 128, 128>}, {pipeline_mode = #tpu.pipeline_mode<synchronous>, transform_indices = @transform_7, window_bounds = array<i64: 1, 128>}, {transform_indices = @transform_8, window_bounds = array<i64: 2, 128>}]} {
    %c0 = arith.constant 0 : index
    %c0_0 = arith.constant 0 : index
    %0 = vector.load %arg1[%c0, %c0_0] : memref<8x128xbf16, #tpu.memory_space<vmem>>, vector<8x128xbf16>
    %c0_1 = arith.constant 0 : index
    %c0_2 = arith.constant 0 : index
    %1 = vector.load %arg2[%c0_1, %c0_2] : memref<128x128xbf16, #tpu.memory_space<vmem>>, vector<128x128xbf16>
    %c0_3 = arith.constant 0 : index
    %c0_4 = arith.constant 0 : index
    %2 = vector.load %arg3[%c0_3, %c0_4] : memref<1x128xf32, #tpu.memory_space<vmem>>, vector<1x128xf32>
    %cst = arith.constant dense<0.000000e+00> : vector<8x128xf32>
    %3 = tpu.matmul %0, %1, %cst {dimension_numbers = #tpu.dot_dimension_numbers<[1], [0], [0], [1], [0, 0, 1, 1], [], []>} : vector<8x128xbf16>, vector<128x128xbf16>, vector<8x128xf32> -> vector<8x128xf32>
    %4 = vector.broadcast %2 : vector<1x128xf32> to vector<8x128xf32>
    %5 = arith.addf %3, %4 : vector<8x128xf32>
    %cst_5 = arith.constant 0.000000e+00 : f32
    %6 = vector.broadcast %cst_5 : f32 to vector<8x128xf32>
    %7 = arith.maximumf %5, %6 : vector<8x128xf32>
    %8 = arith.truncf %7 : vector<8x128xf32> to vector<8x128xbf16>
    %c0_6 = arith.constant 0 : index
    %c0_7 = arith.constant 0 : index
    %9 = vector.load %arg4[%c0_6, %c0_7] : memref<128x128xbf16, #tpu.memory_space<vmem>>, vector<128x128xbf16>
    %c0_8 = arith.constant 0 : index
    %c0_9 = arith.constant 0 : index
    %10 = vector.load %arg5[%c0_8, %c0_9] : memref<1x128xf32, #tpu.memory_space<vmem>>, vector<1x128xf32>
    %cst_10 = arith.constant dense<0.000000e+00> : vector<8x128xf32>
    %11 = tpu.matmul %8, %9, %cst_10 {dimension_numbers = #tpu.dot_dimension_numbers<[1], [0], [0], [1], [0, 0, 1, 1], [], []>} : vector<8x128xbf16>, vector<128x128xbf16>, vector<8x128xf32> -> vector<8x128xf32>
    %12 = vector.broadcast %10 : vector<1x128xf32> to vector<8x128xf32>
    %13 = arith.addf %11, %12 : vector<8x128xf32>
    %cst_11 = arith.constant 0.000000e+00 : f32
    %14 = vector.broadcast %cst_11 : f32 to vector<8x128xf32>
    %15 = arith.maximumf %13, %14 : vector<8x128xf32>
    %16 = arith.truncf %15 : vector<8x128xf32> to vector<8x128xbf16>
    %c0_12 = arith.constant 0 : index
    %c0_13 = arith.constant 0 : index
    %17 = vector.load %arg6[%c0_12, %c0_13] : memref<2x8xbf16, #tpu.memory_space<vmem>>, vector<2x8xbf16>
    %c0_14 = arith.constant 0 : index
    %c0_15 = arith.constant 0 : index
    %18 = vector.load %arg7[%c0_14, %c0_15] : memref<128x128xbf16, #tpu.memory_space<vmem>>, vector<128x128xbf16>
    %c0_16 = arith.constant 0 : index
    %c0_17 = arith.constant 0 : index
    %19 = vector.load %arg8[%c0_16, %c0_17] : memref<1x128xf32, #tpu.memory_space<vmem>>, vector<1x128xf32>
    %cst_18 = arith.constant dense<0.000000e+00> : vector<2x128xf32>
    %20 = tpu.matmul %17, %16, %cst_18 {dimension_numbers = #tpu.dot_dimension_numbers<[1], [0], [0], [1], [0, 0, 1, 1], [], []>} : vector<2x8xbf16>, vector<8x128xbf16>, vector<2x128xf32> -> vector<2x128xf32>
    %cst_19 = arith.constant 2.500000e-01 : f32
    %21 = vector.broadcast %cst_19 : f32 to vector<2x128xf32>
    %22 = arith.mulf %20, %21 : vector<2x128xf32>
    %23 = arith.truncf %22 : vector<2x128xf32> to vector<2x128xbf16>
    %cst_20 = arith.constant dense<0.000000e+00> : vector<2x128xf32>
    %24 = tpu.matmul %23, %18, %cst_20 {dimension_numbers = #tpu.dot_dimension_numbers<[1], [0], [0], [1], [0, 0, 1, 1], [], []>} : vector<2x128xbf16>, vector<128x128xbf16>, vector<2x128xf32> -> vector<2x128xf32>
    %25 = vector.broadcast %19 : vector<1x128xf32> to vector<2x128xf32>
    %26 = arith.addf %24, %25 : vector<2x128xf32>
    %c0_21 = arith.constant 0 : index
    %c0_22 = arith.constant 0 : index
    %27 = vector.load %arg9[%c0_21, %c0_22] : memref<2x128xf32, #tpu.memory_space<vmem>>, vector<2x128xf32>
    tpu.vector_store %arg9[%c0_21, %c0_22], %26 {strides = array<i32>} : memref<2x128xf32, #tpu.memory_space<vmem>>, vector<2x128xf32>,
    return
  }
  func.func @transform_0(%arg0: i32) -> (i32, i32) {
    %c0_i32 = arith.constant 0 : i32
    %c0_i32_0 = arith.constant 0 : i32
    return %arg0, %c0_i32 : i32, i32
  }
  func.func @transform_1(%arg0: i32) -> (i32, i32) {
    %c0_i32 = arith.constant 0 : i32
    %c0_i32_0 = arith.constant 0 : i32
    %c0_i32_1 = arith.constant 0 : i32
    return %c0_i32, %c0_i32_0 : i32, i32
  }
  func.func @transform_2(%arg0: i32) -> (i32, i32) {
    %c0_i32 = arith.constant 0 : i32
    %c0_i32_0 = arith.constant 0 : i32
    %c0_i32_1 = arith.constant 0 : i32
    return %c0_i32, %c0_i32_0 : i32, i32
  }
  func.func @transform_3(%arg0: i32) -> (i32, i32) {
    %c0_i32 = arith.constant 0 : i32
    %c0_i32_0 = arith.constant 0 : i32
    %c0_i32_1 = arith.constant 0 : i32
    return %c0_i32, %c0_i32_0 : i32, i32
  }
  func.func @transform_4(%arg0: i32) -> (i32, i32) {
    %c0_i32 = arith.constant 0 : i32
    %c0_i32_0 = arith.constant 0 : i32
    %c0_i32_1 = arith.constant 0 : i32
    return %c0_i32, %c0_i32_0 : i32, i32
  }
  func.func @transform_5(%arg0: i32) -> (i32, i32) {
    %c0_i32 = arith.constant 0 : i32
    %c0_i32_0 = arith.constant 0 : i32
    %c0_i32_1 = arith.constant 0 : i32
    return %c0_i32, %c0_i32_0 : i32, i32
  }
  func.func @transform_6(%arg0: i32) -> (i32, i32) {
    %c0_i32 = arith.constant 0 : i32
    %c0_i32_0 = arith.constant 0 : i32
    %c0_i32_1 = arith.constant 0 : i32
    return %c0_i32, %c0_i32_0 : i32, i32
  }
  func.func @transform_7(%arg0: i32) -> (i32, i32) {
    %c0_i32 = arith.constant 0 : i32
    %c0_i32_0 = arith.constant 0 : i32
    %c0_i32_1 = arith.constant 0 : i32
    return %c0_i32, %c0_i32_0 : i32, i32
  }
  func.func @transform_8(%arg0: i32) -> (i32, i32) {
    %c0_i32 = arith.constant 0 : i32
    %c0_i32_0 = arith.constant 0 : i32
    return %arg0, %c0_i32 : i32, i32
  }
}

</mosaic_0001>

<bundles_post_ra>
// kernel: tpu_custom_call.1
= control target key start
LH: loop header
LB: loop body
LE: loop exit
PB: predicated region body
PF: predicated region fallthrough
CT: control target
= control target key end

     0   :  { %13 = vsyncpa [#allocation3], 0  ;;  %s722_s0 = inlined_call_operand.hbm [shape: bf16[8,128], index: 0, kind: input, shape index: {}]   ;;  %s723_s1 = inlined_call_operand.hbm [shape: bf16[128,128], index: 1, kind: input, shape index: {}]   ;;  %s724_s2 = inlined_call_operand.vmem [shape: f32[1,128], index: 2, kind: input, shape index: {}]   ;;  %s725_s3 = inlined_call_operand.hbm [shape: bf16[128,128], index: 3, kind: input, shape index: {}]   ;;  %s726_s4 = inlined_call_operand.vmem [shape: f32[1,128], index: 4, kind: input, shape index: {}]   ;;  %s727_s5 = inlined_call_operand.vmem [shape: bf16[2,8], index: 5, kind: input, shape index: {}]   ;;  %s728_s6 = inlined_call_operand.hbm [shape: bf16[128,128], index: 6, kind: input, shape index: {}]   ;;  %s729_s7 = inlined_call_operand.vmem [shape: f32[1,128], index: 7, kind: input, shape index: {}]   ;;  %s730_s8 = inlined_call_operand.hbm [shape: f32[2,128], index: 8, kind: output, shape index: {}]  }
   0x1   :  { %14 = vsyncpa [#allocation6], 0 }
   0x2   :  { %15 = vsyncpa [#allocation9], 0  ;;  %s32_s29 = sshll.u32 %s723_s1, 4  ;;  %s33_s29 = int_to_ptr.hbm [resolvable:$true] %s32_s29 }
   0x3   :  { %16 = vsyncpa [#allocation4], 0  ;;  %s643_s30 = smov [#allocation5]   ;;  %s22_s12 = sshll.u32 %s722_s0, 4  ;;  %s23_s12 = int_to_ptr.hbm [resolvable:$true] %s22_s12 }
   0x4   :  { %s34_s9 = sshll.u32 %s643_s30, 4  ;;  %s644_s13 = smov 64   ;;  %s35_s9 = int_to_ptr.vmem [resolvable:$true] %s34_s9 }
   0x5   :  { %s645_s14 = smov 4   ;;  %s646_s15 = smov [#allocation2]  }
   0x6   :  { %40 = dma.hbm_to_vmem [thread:$0]  %s33_s29, 1024, %s35_s9, [#allocation6], %s644_s13, %s644_s13, %s645_s14  }
   0x7   :  { %s24_s16 = sshll.u32 %s646_s15, 4  ;;  %s47_s19 = sshll.u32 %s725_s3, 4  ;;  %s25_s16 = int_to_ptr.vmem [resolvable:$true] %s24_s16  ;;  %s48_s19 = int_to_ptr.hbm [resolvable:$true] %s47_s19 }
   0x8   :  { %27 = dma.hbm_to_vmem [thread:$0]  %s23_s12, 64, %s25_s16, [#allocation3]  }
   0x9   :  { %s64_s21 = sshll.u32 %s728_s6, 4  ;;  %s647_s22 = smov [#allocation7]   ;;  %s65_s21 = int_to_ptr.hbm [resolvable:$true] %s64_s21 }
   0xa   :  { %s49_s23 = sshll.u32 %s647_s22, 4  ;;  %s648_s0 = smov [#allocation8]   ;;  %s50_s23 = int_to_ptr.vmem [resolvable:$true] %s49_s23 }
   0xb   :  { %55 = dma.hbm_to_vmem [thread:$0]  %s48_s19, 1024, %s50_s23, [#allocation6], %s644_s13, %s644_s13, %s645_s14  }
   0xc   :  { %s66_s24 = sshll.u32 %s648_s0, 4  ;;  %s67_s24 = int_to_ptr.vmem [resolvable:$true] %s66_s24 }
   0xd   :  { %72 = dma.hbm_to_vmem [thread:$0]  %s65_s21, 1024, %s67_s24, [#allocation9], %s644_s13, %s644_s13, %s645_s14  }
   0xe   :  { %635 = dma.done.wait [#allocation3], 64  }
   0xf   :  { %636 = vsyncadd [#allocation3], 4294967232 }
  0x10   :  { %637 = dma.done.wait [#allocation6], 2048  }
  0x11   :  { %638 = vsyncadd [#allocation6], 4294965248 }
  0x12   :  { %639 = dma.done.wait [#allocation9], 1024  }
  0x13   :  { %640 = vsyncadd [#allocation9], 4294966272  ;;  %v488_v0 = vld [vmem:[#allocation5 + $0x38] sm:$0xff]  ;;  %v487_v1 = vld [vmem:[#allocation5 + $0x30] sm:$0xff]  ;;  %vm281_vm0 = vcmask 1043456   ;;  %vm277_vm1 = vcmask 64512  }
  0x14   :  { %161 = vmatpush.bf16.msra.mxu0 %v488_v0  ;;  %v496_v2 = vld [vmem:[#allocation7 + $0x38] sm:$0xff]  ;;  %v495_v3 = vld [vmem:[#allocation7 + $0x30] sm:$0xff]  ;;  %v486_v4 = vld [vmem:[#allocation5 + $0x28] sm:$0xff]  ;;  %s649_s29 = smov [#allocation10]   ;;  %s372_s11 = sshll.u32 %s730_s8, 4  ;;  %s373_s11 = int_to_ptr.hbm [resolvable:$true] %s372_s11 }
  0x15   :  { %244 = vmatpush.bf16.msra.mxu1 %v496_v2  ;;  %v494_v5 = vld [vmem:[#allocation7 + $0x28] sm:$0xff]  ;;  %v485_v6 = vld [vmem:[#allocation5 + $0x20] sm:$0xff]  ;;  %v484_v8 = vld [vmem:[#allocation5 + $0x18] sm:$0xff]  ;;  %s370_s30 = sshll.u32 %s649_s29, 4  ;;  %s371_s30 = int_to_ptr.vmem [resolvable:$true] %s370_s30 }
  0x16   :  { %v493_v7 = vld [vmem:[#allocation7 + $0x20] sm:$0xff]  ;;  %v492_v9 = vld [vmem:[#allocation7 + $0x18] sm:$0xff]  ;;  %v483_v10 = vld [vmem:[#allocation5 + $0x10] sm:$0xff] }
  0x17   :  { %v491_v11 = vld [vmem:[#allocation7 + $0x10] sm:$0xff]  ;;  %v482_v12 = vld [vmem:[#allocation5 + $0x8] sm:$0xff]  ;;  %v481_v13 = vld [vmem:[#allocation5] sm:$0xff] }
  0x18   :  { %162 = vmatpush.bf16.msra.mxu0 %v487_v1  ;;  %v92_v14 = vld [vmem:[#allocation2] sm:$0xf]  ;;  %v490_v15 = vld [vmem:[#allocation7 + $0x8] sm:$0xff]  ;;  %v489_v16 = vld [vmem:[#allocation7] sm:$0xff] }
  0x19   :  { %245 = vmatpush.bf16.msra.mxu1 %v495_v3  ;;  %v512_v17 = vld [vmem:[%s724_s2] ss:$0 sm:$0xff]  ;;  %v503_v24 = vld [vmem:[#allocation8 + $0x30] sm:$0xff]  ;;  %v502_v25 = vld [vmem:[#allocation8 + $0x28] sm:$0xff] }
  0x1a   :  { %v504_v23 = vld [vmem:[#allocation8 + $0x38] sm:$0xff]  ;;  %v501_v26 = vld [vmem:[#allocation8 + $0x20] sm:$0xff]  ;;  %v499_v29 = vld [vmem:[#allocation8 + $0x10] sm:$0xff] }
  0x1b   :  { %351 = vmatpush.bf16.msra.mxu3 %v504_v23  ;;  %v500_v27 = vld [vmem:[#allocation8 + $0x18] sm:$0xff]  ;;  %v498_v32 = vld [vmem:[#allocation8 + $0x8] sm:$0xff]  ;;  %v497_v38 = vld [vmem:[#allocation8] sm:$0xff] }
  0x1c   :  { %163 = vmatpush.bf16.msra.mxu0 %v486_v4  ;;  %v513_v28 = vld [vmem:[%s726_s4] ss:$0 sm:$0xff] }
  0x1d   :  { %246 = vmatpush.bf16.msra.mxu1 %v494_v5  ;;  %v259_v37 = vld [vmem:[%s727_s5] sm:$0x1] }
  0x1e   :  { %v514_v43 = vld [vmem:[%s729_s7] ss:$0 sm:$0xff] }
  0x1f   :  { %352 = vmatpush.bf16.msra.mxu3 %v503_v24 }
  0x20   :  { %164 = vmatpush.bf16.msra.mxu0 %v485_v6 }
  0x21   :  { %247 = vmatpush.bf16.msra.mxu1 %v493_v7 }
  0x23   :  { %353 = vmatpush.bf16.msra.mxu3 %v502_v25 }
  0x24   :  { %165 = vmatpush.bf16.msra.mxu0 %v484_v8 }
  0x25   :  { %248 = vmatpush.bf16.msra.mxu1 %v492_v9 }
  0x27   :  { %354 = vmatpush.bf16.msra.mxu3 %v501_v26 }
  0x28   :  { %166 = vmatpush.bf16.msra.mxu0 %v483_v10 }
  0x29   :  { %249 = vmatpush.bf16.msra.mxu1 %v491_v11 }
  0x2b   :  { %355 = vmatpush.bf16.msra.mxu3 %v500_v27 }
  0x2c   :  { %167 = vmatpush.bf16.msra.mxu0 %v482_v12 }
  0x2d   :  { %250 = vmatpush.bf16.msra.mxu1 %v490_v15 }
  0x2f   :  { %356 = vmatpush.bf16.msra.mxu3 %v499_v29 }
  0x30   :  { %168 = vmatpush.bf16.msra.mxu0 %v481_v13 }
  0x31   :  { %251 = vmatpush.bf16.msra.mxu1 %v489_v16 }
  0x33   :  { %169 = vmatmul.bf16.vlgmr.msra.gmra.mxu0 %v92_v14  ;;  %357 = vmatpush.bf16.msra.mxu3 %v498_v32 }
  0x37   :  { %358 = vmatpush.bf16.msra.mxu3 %v497_v38 }
  0xb0   :  { %v170_v18 = vpop.f32.mrf.mxu0 }
  0xb1   :  { %v171_v19 = vadd.f32 %v512_v17, %v170_v18 }
  0xb3   :  { %v174_v20 = vmax.f32 %v171_v19, 0.0 }
  0xb5   :  { %v175_v21 = vpack.c.bf16 %v174_v20, %v174_v20 }
  0xb7   :  { %252 = vmatmul.bf16.vlgmr.msra.gmra.mxu1 %v175_v21 }
  0xb8   :  { %v172_v22 = vpop.f32.mrf.mxu0 }
 0x134   :  { %v253_v30 = vpop.f32.mrf.mxu1 }
 0x135   :  { %v254_v31 = vadd.f32 %v513_v28, %v253_v30 }
 0x137   :  { %v257_v33 = vmax.f32 %v254_v31, 0.0 }
 0x139   :  { %v258_v34 = vpack.c.bf16 %v257_v33, %v257_v33 }
 0x13b   :  { %v283_v35 = vsel %vm281_vm0, %v258_v34, 0 }
 0x13c   :  { %v255_v36 = vpop.f32.mrf.mxu1  ;;  %292 = vmatpush.bf16.msra.mxu2 %v283_v35 }
 0x13f   :  { %448 = vmatmul.msk.bf16.vlgmr.msra.gmra.mxu2 %vm277_vm1, %v259_v37 }
 0x1c2   :  { %v294_v39 = vpop.f32.mrf.mxu2 }
 0x1c3   :  { %v298_v40 = vmul.f32 0.25, %v294_v39 }
 0x1c5   :  { %v299_v41 = vpack.c.bf16 %v298_v40, %v298_v40 }
 0x1c7   :  { %359 = vmatmul.bf16.vlgmr.msra.gmra.mxu3 %v299_v41 }
 0x1ca   :  { %v296_v42 = vpop.f32.mrf.mxu2 }
 0x24a   :  { %v360_v44 = vpop.f32.mrf.mxu3 }
 0x24b   :  { %v361_v45 = vadd.f32 %v514_v43, %v360_v44 }
 0x24d   :  { %364 = vst [vmem:[#allocation10] sm:$0x3] %v361_v45 }
 0x24e   :  { %375 = dma.vmem_to_hbm [thread:$0]  %s371_s30, 32, %s373_s11, [#allocation4]  }
 0x252   :  { %v362_v46 = vpop.f32.mrf.mxu3 }
 0x253   :  { %641 = dma.done.wait [#allocation4], 32  }
 0x254   :  { %642 = vsyncadd [#allocation4], 4294967264 }
 0x255   :  { %380 = vsyncpa [#allocation3], 1 }
 0x256   :  { %381 = vsyncpa [#allocation6], 1 }
 0x257   :  { %382 = vsyncpa [#allocation9], 1 }
 0x258   :  { %383 = vsyncpa [#allocation4], 1 }

</bundles_post_ra>
